<compile_context>
chip_gen: v5e
topology: v5e:2x2
jax: 0.10.0
libtpu: 0.0.40
codegen_flags: <defaults>
</compile_context>

<pallas_src>
import jax
import jax.numpy as jnp
from jax.experimental import pallas as pl
from jax.experimental.pallas import tpu as pltpu


def _round_up(n, m):
    return ((n + m - 1) // m) * m


def _default_tile_b(batch, hidden, itemsize):
    """Pick a batch-tile that keeps the double-buffered x tile VMEM-friendly.

    Budget ~8 MiB per x buffer (2 buffers ~= 16 MiB), under the 32 MiB default
    scoped-VMEM limit and v7x's 64 MiB physical VMEM, while being >=128 rows
    (ideally 512-2048) to amortize the ~0.35 us per-grid-step overhead.
    """
    budget = 8 * 1024 * 1024
    tb = budget // max(1, hidden * itemsize)
    tb = max(128, min(2048, (tb // 128) * 128))
    tb = min(tb, _round_up(batch, 128))
    return int(tb)


def _linear_critic_kernel(x_ref, w_ref, b_ref, o_ref):
    # x_ref: (TB, H)    VMEM tile, pipelined (double-buffered) over the grid
    # w_ref: (1, H)     VMEM, constant index_map -> loaded once, stays resident
    # b_ref: (1,)       SMEM scalar bias
    # o_ref: (1, 1, TB) lane-dense output tile
    x = x_ref[...]
    w = w_ref[...].astype(x.dtype)
    # (1, H) . (TB, H)^T -> (1, TB): per-row dot products land lane-major, so
    # the store below is a dense full-lane store rather than TB masked 1-lane
    # stores.  f32 accumulation regardless of input dtype.
    vals = jax.lax.dot_general(
        w, x,
        dimension_numbers=(((1,), (1,)), ((), ())),
        preferred_element_type=jnp.float32,
    )
    o_ref[0] = (vals + b_ref[0]).astype(o_ref.dtype)


def linear_critic_forward(x, w, b, *, tile_b=None):
    """LinearCritic forward: squeeze(x @ w.T + b).

    x: (..., H) activations (float32 or bfloat16)
    w: (1, H) weight (torch nn.Linear layout); (H,) / (H, 1) also accepted
    b: (1,)   bias
    returns: value per row with all size-1 dims squeezed (matches torch .squeeze())
    """
    x = jnp.asarray(x)
    lead_shape = x.shape[:-1]
    hidden = x.shape[-1]
    x2 = x.reshape(-1, hidden)
    batch = x2.shape[0]

    w_row = jnp.asarray(w).reshape(1, hidden)
    b_vec = jnp.asarray(b).reshape(1)

    tb = int(tile_b) if tile_b is not None else _default_tile_b(
        batch, hidden, x2.dtype.itemsize)
    tb = max(128, _round_up(tb, 128))
    batch_pad = _round_up(batch, tb)
    if batch_pad != batch:
        x2 = jnp.pad(x2, ((0, batch_pad - batch), (0, 0)))
    num_tiles = batch_pad // tb

    out = pl.pallas_call(
        _linear_critic_kernel,
        out_shape=jax.ShapeDtypeStruct((num_tiles, 1, tb), x2.dtype),
        grid_spec=pl.GridSpec(
            grid=(num_tiles,),
            in_specs=[
                # x: pipelined batch tiles
                pl.BlockSpec((tb, hidden), lambda i: (i, 0)),
                # w: constant index_map -> single DMA, VMEM-resident
                pl.BlockSpec((1, hidden), lambda i: (0, 0)),
                # bias: scalar in SMEM
                pl.BlockSpec(memory_space=pltpu.MemorySpace.SMEM),
            ],
            out_specs=pl.BlockSpec((1, 1, tb), lambda i: (i, 0, 0)),
        ),
        compiler_params=pltpu.CompilerParams(
            # independent batch tiles -> megacore sharding on v7x (2 TCs)
            dimension_semantics=("parallel",),
        ),
    )(x2, w_row, b_vec)

    flat = out.reshape(batch_pad)[:batch]
    v = flat.reshape(lead_shape)
    # torch's .squeeze(): drop all size-1 dims
    return jnp.squeeze(v)


if __name__ == "__main__":
    hidden_size = 64   # LinearCritic default
    batch = 256

    kx, kw, kb = jax.random.split(jax.random.PRNGKey(0), 3)
    x = jax.random.normal(kx, (batch, hidden_size), jnp.float32)
    bound = 1.0 / (hidden_size ** 0.5)
    # torch nn.Linear(hidden_size, 1): weight (1, hidden_size), bias (1,)
    w = jax.random.uniform(kw, (1, hidden_size), jnp.float32, -bound, bound)
    b = jax.random.uniform(kb, (1,), jnp.float32, -bound, bound)

    # tile_b=128 -> grid=(2,) at this small demo size, exercising the pipeline.
    v = linear_critic_forward(x, w, b, tile_b=128)
    v = jax.block_until_ready(v)

    ref = jnp.squeeze(x @ w.T + b)
    assert v.shape == (batch,), v.shape
    assert jnp.allclose(v, ref, atol=1e-5, rtol=1e-5), "mismatch vs reference"

    print("KERNEL_OK")
</pallas_src>

<mosaic_0001>
module attributes {stable_mosaic.version = 11 : i64} {
  func.func @_linear_critic_kernel(%arg0: i32, %arg1: memref<128x64xf32, #tpu.memory_space<vmem>>, %arg2: memref<1x64xf32, #tpu.memory_space<vmem>>, %arg3: memref<1xf32, #tpu.memory_space<smem>>, %arg4: memref<1x1x128xf32, #tpu.memory_space<vmem>>) attributes {dimension_semantics = [#tpu.dimension_semantics<parallel>], iteration_bounds = array<i64: 2>, scalar_prefetch = 0 : i64, scratch_operands = 0 : i64, tpu.core_type = #tpu.core_type<tc>, window_params = [{transform_indices = @transform_0, window_bounds = array<i64: 128, 64>}, {pipeline_mode = #tpu.pipeline_mode<synchronous>, transform_indices = @transform_1, window_bounds = array<i64: 1, 64>}, {transform_indices = @transform_2, window_bounds = array<i64: 1>}, {transform_indices = @transform_3, window_bounds = array<i64: 1, 1, 128>}]} {
    %c0 = arith.constant 0 : index
    %c0_0 = arith.constant 0 : index
    %0 = vector.load %arg1[%c0, %c0_0] : memref<128x64xf32, #tpu.memory_space<vmem>>, vector<128x64xf32>
    %c0_1 = arith.constant 0 : index
    %c0_2 = arith.constant 0 : index
    %1 = vector.load %arg2[%c0_1, %c0_2] : memref<1x64xf32, #tpu.memory_space<vmem>>, vector<1x64xf32>
    %cst = arith.constant dense<0.000000e+00> : vector<1x128xf32>
    %2 = tpu.matmul %1, %0, %cst {dimension_numbers = #tpu.dot_dimension_numbers<[1], [1], [0], [0], [0, 0, 1, 0], [], []>} : vector<1x64xf32>, vector<128x64xf32>, vector<1x128xf32> -> vector<1x128xf32>
    %c0_3 = arith.constant 0 : index
    %3 = memref.load %arg3[%c0_3] : memref<1xf32, #tpu.memory_space<smem>>
    %4 = vector.broadcast %3 : f32 to vector<1x128xf32>
    %5 = arith.addf %2, %4 : vector<1x128xf32>
    %c0_4 = arith.constant 0 : index
    %c0_5 = arith.constant 0 : index
    %c0_6 = arith.constant 0 : index
    %6 = vector.load %arg4[%c0_4, %c0_5, %c0_6] : memref<1x1x128xf32, #tpu.memory_space<vmem>>, vector<1x1x128xf32>
    %7 = vector.shape_cast %6 : vector<1x1x128xf32> to vector<1x128xf32>
    %8 = vector.shape_cast %5 : vector<1x128xf32> to vector<1x1x128xf32>
    tpu.vector_store %arg4[%c0_4, %c0_5, %c0_6], %8 {strides = array<i32>} : memref<1x1x128xf32, #tpu.memory_space<vmem>>, vector<1x1x128xf32>,
    return
  }
  func.func @transform_0(%arg0: i32) -> (i32, i32) {
    %c0_i32 = arith.constant 0 : i32
    %c0_i32_0 = arith.constant 0 : i32
    return %arg0, %c0_i32 : i32, i32
  }
  func.func @transform_1(%arg0: i32) -> (i32, i32) {
    %c0_i32 = arith.constant 0 : i32
    %c0_i32_0 = arith.constant 0 : i32
    %c0_i32_1 = arith.constant 0 : i32
    return %c0_i32, %c0_i32_0 : i32, i32
  }
  func.func @transform_2(%arg0: i32) -> i32 {
    %c0_i32 = arith.constant 0 : i32
    %c0_i32_0 = arith.constant 0 : i32
    return %c0_i32 : i32
  }
  func.func @transform_3(%arg0: i32) -> (i32, i32, i32) {
    %c0_i32 = arith.constant 0 : i32
    %c0_i32_0 = arith.constant 0 : i32
    %c0_i32_1 = arith.constant 0 : i32
    return %arg0, %c0_i32, %c0_i32_0 : i32, i32, i32
  }
}

</mosaic_0001>

<bundles_post_ra>
// kernel: tpu_custom_call.1
= control target key start
LH: loop header
LB: loop body
LE: loop exit
PB: predicated region body
PF: predicated region fallthrough
CT: control target
= control target key end

     0   :  { %s604_s0 = inlined_call_operand.vmem [shape: f32[256,64], index: 0, kind: input, shape index: {}]   ;;  %s605_s1 = inlined_call_operand.vmem [shape: f32[1,64], index: 1, kind: input, shape index: {}]   ;;  %s606_s2 = inlined_call_operand.<no memory space> [shape: f32[1], index: 2, kind: input, shape index: {}]   ;;  %s607_s3 = inlined_call_operand.hbm [shape: f32[2,1,128], index: 3, kind: output, shape index: {}]  }
   0x1   :  { %8 = sst [smem:[#allocation2]] %s606_s2 }
   0x2   :  { %9 = vsyncpa [#allocation4], 0 }
   0x3   :  { %11 = vsyncpa [#allocation4 + $0x1], 0  ;;  %s482_s14 = smov 0   ;;  %s484_s15 = smov 0  }
   0x4   :  { %s486_s16 = smov 0   ;;  %s488_s17 = smov 0  }
   0x5 LB: > { %s503_s2 = sadd.s32 4294967295, %s457_s17   ;;  %s331_s18 = sadd.s32 4294967294, %s457_s17   ;;  %s457_s17 = sphi %s488_s17, %s613_s17   ;;  %s453_s16 = sphi %s486_s16, %s612_s16   ;;  %s449_s15 = sphi %s484_s15, %s611_s15   ;;  %s445_s14 = sphi %s482_s14, %s610_s14  }
   0x6   : > { %s507_s19 = sadd.s32 1, %s457_s17   ;;  %s92_s20 = sadd.s32 1, %s453_s16 }
   0x7   : > { %s89_s21 = ssub.s32 %s457_s17, %s507_s19  ;;  %p102_p0 = scmp.ne.s32.totalorder %s453_s16, %s449_s15 }
   0x8   : > { %p90_p1 = scmp.eq.s32.totalorder %s89_s21, 0  ;;  %p103_p2 = scmp.eq.s32.totalorder %s503_s2, 1 }
   0x9   : > { %p108_p3 = scmp.ne.s32.totalorder %s449_s15, %s445_s14  ;;  %p109_p4 = scmp.eq.s32.totalorder %s331_s18, 1 }
   0xa   : > { %s518_s22 = scalar_select %p90_p1, %s453_s16, %s92_s20  }
   0xb   : > { %p520_p5 = por %p103_p2, %p102_p0  ;;  %p524_p6 = por %p109_p4, %p108_p3 }
   0xc   : > { %p334_p7 = scmp.ge.s32.totalorder %s457_s17, 1  ;;  %p142_p8 = scmp.lt.s32.totalorder %s457_s17, 3 }
   0xe   : > { %p143_p9 = pnand %p334_p7, %p142_p8 }
   0xf   : > { %s335_s25 = sshll.u32 (!%p143_p9), %s503_s2, 4  ;;  %s188_s5 = sld [smem:[#allocation2]] (!%p143_p9) }
  0x10   : > { %146 = sbr.rel (%p143_p9) target bundleno = 219 (0xdb), region = 32  ;;  %p166_p10 = scmp.lt.s32.totalorder (!%p143_p9), %s335_s25, 31 }
  0x11   : > { %s163_s6 = sand.u32 (!%p143_p9), 1, %s449_s15   ;;  %s272_s9 = scalar_lea.hbm (!%p143_p9), %s607_s3, %s503_s2 }
  0x12   : > { %s164_s10 = scalar_lea.vmem (!%p143_p9), [#allocation3], %s163_s6  ;;  %s276_s12 = sshll.u32 (!%p143_p9), %s272_s9, 4  ;;  %s277_s12 = int_to_ptr.hbm [resolvable:$true] %s276_s12 }
  0x13   : > { %s274_s11 = sshll.u32 (!%p143_p9), %s164_s10, 4  ;;  %s264_s13 = scalar_lea.sflag (!%p143_p9), [#allocation4], %s163_s6  ;;  %s275_s11 = int_to_ptr.vmem [resolvable:$true] %s274_s11 }
  0x14   : > { %s409_s18 = sshra.s32 (!%p143_p9), %s277_s12, 4  ;;  %s415_s2 = scalar_lea.hbm (!%p143_p9), %s607_s3, 2  ;;  %s410_s18 = int_to_ptr.hbm [resolvable:$true] %s409_s18 }
  0x15   : > { %s615_s25 = smov (!%p166_p10, %s335_s25), 31  ;;  %vm190_vm0 = vcmask 523264   ;;  %v187_v16 = vld [vmem:[%s605_s1] sm:$0x1]  ;;  %v189_v17 = vstv %s188_s5  ;;  %s411_s20 = scalar_lea.hbm %s410_s18, 1 }
  0x16   : > { %s336_s26 = sshll.u32 %s615_s25, 3  ;;  %p412_p11 = scmp.ne.s32.totalorder %s410_s18, %s411_s20 }
  0x17   : > { %s534_s29 = scalar_lea.vmem %s604_s0, %s336_s26  ;;  %p416_p0 = scmp.lt.s32.totalorder %s410_s18, %s607_s3 }
  0x18   : > { %v186_v0 = vld [vmem:[%s534_s29 + $0x78] sm:$0xff]  ;;  %v185_v1 = vld [vmem:[%s534_s29 + $0x70] sm:$0xff]  ;;  %v184_v2 = vld [vmem:[%s534_s29 + $0x68] sm:$0xff]  ;;  %p413_p12 = pnand %p412_p11, %p520_p5  ;;  %p417_p1 = scmp.lt.s32.totalorder %s415_s2, %s411_s20 }
  0x19   : > { %337 = vmatpush.xpose.msk.msra.mxu0 %vm190_vm0, %v186_v0  ;;  %v183_v3 = vld [vmem:[%s534_s29 + $0x60] sm:$0xff]  ;;  %v182_v4 = vld [vmem:[%s534_s29 + $0x58] sm:$0xff]  ;;  %v181_v5 = vld [vmem:[%s534_s29 + $0x50] sm:$0xff] }
  0x1a   : > { %v180_v6 = vld [vmem:[%s534_s29 + $0x48] sm:$0xff]  ;;  %v179_v7 = vld [vmem:[%s534_s29 + $0x40] sm:$0xff]  ;;  %v178_v8 = vld [vmem:[%s534_s29 + $0x38] sm:$0xff]  ;;  %p414_p13 = pneg %p413_p12  ;;  %p418_p2 = por %p417_p1, %p416_p0 }
  0x1b   : > { %v177_v9 = vld [vmem:[%s534_s29 + $0x30] sm:$0xff]  ;;  %v176_v10 = vld [vmem:[%s534_s29 + $0x28] sm:$0xff]  ;;  %v175_v11 = vld [vmem:[%s534_s29 + $0x20] sm:$0xff] }
  0x1c   : > { %v174_v12 = vld [vmem:[%s534_s29 + $0x18] sm:$0xff]  ;;  %v173_v13 = vld [vmem:[%s534_s29 + $0x10] sm:$0xff]  ;;  %v172_v14 = vld [vmem:[%s534_s29 + $0x8] sm:$0xff]  ;;  %p419_p3 = pnand %p418_p2, %p414_p13 }
  0x1d   : > { %338 = vmatpush.xpose.msk.msra.mxu0 %vm190_vm0, %v185_v1  ;;  %v171_v15 = vld [vmem:[%s534_s29] sm:$0xff] }
  0x21   : > { %339 = vmatpush.xpose.msk.msra.mxu0 %vm190_vm0, %v184_v2 }
  0x25   : > { %340 = vmatpush.xpose.msk.msra.mxu0 %vm190_vm0, %v183_v3 }
  0x29   : > { %341 = vmatpush.xpose.msk.msra.mxu0 %vm190_vm0, %v182_v4 }
  0x2d   : > { %342 = vmatpush.xpose.msk.msra.mxu0 %vm190_vm0, %v181_v5 }
  0x31   : > { %343 = vmatpush.xpose.msk.msra.mxu0 %vm190_vm0, %v180_v6 }
  0x35   : > { %344 = vmatpush.xpose.msk.msra.mxu0 %vm190_vm0, %v179_v7 }
  0x39   : > { %345 = vmatpush.xpose.msk.msra.mxu0 %vm190_vm0, %v178_v8 }
  0x3d   : > { %346 = vmatpush.xpose.msk.msra.mxu0 %vm190_vm0, %v177_v9 }
  0x41   : > { %347 = vmatpush.xpose.msk.msra.mxu0 %vm190_vm0, %v176_v10 }
  0x45   : > { %348 = vmatpush.xpose.msk.msra.mxu0 %vm190_vm0, %v175_v11 }
  0x49   : > { %349 = vmatpush.xpose.msk.msra.mxu0 %vm190_vm0, %v174_v12 }
  0x4d   : > { %350 = vmatpush.xpose.msk.msra.mxu0 %vm190_vm0, %v173_v13 }
  0x51   : > { %351 = vmatpush.xpose.msk.msra.mxu0 %vm190_vm0, %v172_v14 }
  0x55   : > { %352 = vmatpush.xpose.msk.msra.mxu0 %vm190_vm0, %v171_v15 }
  0x58   : > { %353 = vmatmul.msk.f32.vlgmr.msra.gmra.mxu0 %vm190_vm0, %v187_v16 }
  0xd5   : > { %v259_v18 = vpop.f32.mrf.mxu0 }
  0xd6   : > { %v260_v19 = vadd.f32 %v259_v18, %v189_v17 }
  0xd8   : > { %262 = vst [vmem:[%s164_s10] sm:$0x1] %v260_v19 }
  0xd9   : > { %422 = shalt.err (!%p419_p3)
}
  0xda   : > { %356 = dma.vmem_to_hbm [thread:$0]  (%p520_p5), %s275_s11, 16, %s277_s12, %s264_s13  }
  0xdb PF: > { %p362_p4 = scmp.ge.s32.totalorder %s457_s17, 2  ;;  %s288_s28 = sand.u32 1, %s445_s14  }
  0xdc   : > { %s289_s29 = scalar_lea.sflag [#allocation4], %s288_s28 }
  0xdd   : > { %p359_p7 = pnand %p362_p4, %p524_p6 }
  0xdf   : > { %p360_p8 = pneg %p359_p7 }
  0xe1   : > { %440 = dma.done.wait (%p360_p8), %s289_s29, 16  }
  0xe2   : > { %442 = vsyncadd (%p360_p8), %s289_s29, 4294967280  ;;  %p14_p9 = scmp.ge.s32.totalorder %s507_s19, 4   ;;  %s610_s14 = smov %s449_s15 }
  0xe3   : > { %s611_s15 = smov %s453_s16  ;;  %s612_s16 = smov %s518_s22 }
  0xe4   : > { %s613_s17 = smov %s507_s19  ;;  %16 = sbr.rel (!%p14_p9) target bundleno = 5 (0x5), region = 67 }
  0xe9   :  { %294 = vsyncpa [#allocation4], 1 }
  0xea   :  { %296 = vsyncpa [#allocation4 + $0x1], 1 }

</bundles_post_ra>
